<compile_context>
chip_gen: v5e
topology: v5e:2x2
jax: 0.10.0
libtpu: 0.0.40
codegen_flags: <defaults>
</compile_context>

<pallas_src>
from functools import partial

import jax
import jax.numpy as jnp
from jax import lax
from jax.experimental import pallas as pl
from jax.experimental.pallas import tpu as pltpu


# ----------------------------- Pallas kernel ------------------------------ #
def _ssa_kernel(gamma_ref, w_ref, x_ref, o_ref, *, bp, tn, nt):
    # gamma_ref: (1,)        f32 in SMEM
    # w_ref    : (C, C)      f32 (spectrally-normalized ks=1 conv weight)
    # x_ref    : (bp, C, Np) f32  -- bp batch items, lane-padded N
    # o_ref    : (bp, C, Np) f32
    gamma = gamma_ref[0]                                   # scalar f32
    w_bf = w_ref[...].astype(jnp.bfloat16)                 # (C, C) bf16 for MXU

    for b in range(bp):                                    # static per-step batch
        x_full = x_ref[b]                                  # (C, Np) f32
        x_bf = x_full.astype(jnp.bfloat16)

        # xxT = x @ x^T expressed as a lane-axis contraction: no explicit
        # transpose, no (Np, C) temporary; MXU consumes both operands in place.
        xxT = lax.dot_general(
            x_bf, x_bf,
            dimension_numbers=(((1,), (1,)), ((), ())),
            preferred_element_type=jnp.float32)            # (C, C) f32
        xxT_bf = xxT.astype(jnp.bfloat16)

        # Stream convx / o / epilogue over N in lane tiles so only xxT stays
        # live full-width; stores to o_ref are lane-dense (tn % 128 == 0).
        def n_tile(t, carry):
            n0 = pl.multiple_of(t * tn, tn)
            x_t = x_ref[b, :, pl.ds(n0, tn)]               # (C, tn) f32
            convx_t = jnp.dot(w_bf, x_t.astype(jnp.bfloat16),
                              preferred_element_type=jnp.float32)
            o_t = jnp.dot(xxT_bf, convx_t.astype(jnp.bfloat16),
                          preferred_element_type=jnp.float32)
            o_ref[b, :, pl.ds(n0, tn)] = (gamma * o_t + x_t).astype(o_ref.dtype)
            return carry

        lax.fori_loop(0, nt, n_tile, 0, unroll=nt <= 8)


# ------------------------------- wrapper ----------------------------------- #
def _round_up(v, m):
    return (v + m - 1) // m * m


def simple_self_attention(x_nchw, w_cc, gamma, sym=False):
    """JAX/Pallas equivalent of SimpleSelfAttention.forward (ks=1)."""
    B, C, H, W = x_nchw.shape
    N = H * W

    w_cc = jnp.asarray(w_cc, jnp.float32)
    if sym:  # symmetrize the ks=1 conv weight, same as the PyTorch branch
        w_cc = (w_cc + w_cc.T) * 0.5

    # Lane-align N (masked partial stores are the biggest layout penalty).
    Np = _round_up(N, 128)
    x = x_nchw.reshape(B, C, N).astype(jnp.float32)
    if Np != N:
        x = jnp.pad(x, ((0, 0), (0, 0), (0, Np - N)))

    # Batch items per grid step: for small C the MXU is underfilled and the
    # ~0.35us/step overhead dominates, so pack several images per step while
    # keeping the per-step x slab small (<= 4 MiB) for v7x VMEM headroom.
    bp = 1
    for cand in range(min(B, max(1, 128 // max(C, 1))), 0, -1):
        if B % cand == 0 and cand * C * Np * 4 <= 4 * 1024 * 1024:
            bp = cand
            break

    # Lane tile for the streamed phase (always a multiple of 128 dividing Np).
    if Np <= 512:
        TN = Np
    elif Np % 512 == 0:
        TN = 512
    elif Np % 256 == 0:
        TN = 256
    else:
        TN = 128
    NT = Np // TN

    gamma_arr = jnp.asarray(gamma, jnp.float32).reshape(1)

    # Explicit VMEM budget: double-buffered in/out slabs + weight + intermediates.
    slab = bp * C * Np * 4
    est = 2 * 2 * slab                     # x in + o out, double-buffered
    est += 2 * C * C * 4                   # weight, double-buffered
    est += C * Np * (4 + 2)                # full x f32 value + bf16 copy (xxT phase)
    est += C * C * (4 + 2)                 # xxT f32 + bf16
    est += C * TN * (4 + 2 + 4 + 4)        # per-tile x / bf16 / convx / o
    vmem_limit = int(min(48 * 2**20, max(32 * 2**20, 2 * est)))

    cost = pl.CostEstimate(
        flops=6 * B * C * C * Np,                      # three (C,C,N) matmuls
        transcendentals=0,
        bytes_accessed=2 * B * C * Np * 4 + C * C * 4 + 4)

    kernel = partial(_ssa_kernel, bp=bp, tn=TN, nt=NT)

    out = pl.pallas_call(
        kernel,
        out_shape=jax.ShapeDtypeStruct((B, C, Np), x.dtype),
        grid_spec=pltpu.PrefetchScalarGridSpec(
            num_scalar_prefetch=0,
            grid=(B // bp,),
            in_specs=[
                pl.BlockSpec(memory_space=pltpu.MemorySpace.SMEM),   # gamma scalar
                pl.BlockSpec((C, C), lambda g: (0, 0)),              # weight (resident)
                pl.BlockSpec((bp, C, Np), lambda g: (g, 0, 0)),      # x block
            ],
            out_specs=pl.BlockSpec((bp, C, Np), lambda g: (g, 0, 0)),
        ),
        compiler_params=pltpu.CompilerParams(
            dimension_semantics=("parallel",),
            vmem_limit_bytes=vmem_limit),
        cost_estimate=cost,
    )(gamma_arr, w_cc, x)

    out = out[:, :, :N]
    return out.reshape(B, C, H, W)


# --------------------------- pure-JAX reference ----------------------------- #
def simple_self_attention_ref(x_nchw, w_cc, gamma, sym=False,
                              matmul_dtype=jnp.float32):
    """Reference. matmul_dtype=bf16 mirrors the kernel's MXU operand precision."""
    B, C, H, W = x_nchw.shape
    w_cc = jnp.asarray(w_cc, jnp.float32)
    if sym:
        w_cc = (w_cc + w_cc.T) * 0.5
    x = x_nchw.reshape(B, C, -1).astype(jnp.float32)
    xm = x.astype(matmul_dtype)
    wm = w_cc.astype(matmul_dtype)
    convx = jnp.einsum('oc,bcn->bon', wm, xm, preferred_element_type=jnp.float32)
    xxT = jnp.einsum('bcn,bdn->bcd', xm, xm, preferred_element_type=jnp.float32)
    o = jnp.einsum('bcd,bdn->bcn', xxT.astype(matmul_dtype),
                   convx.astype(matmul_dtype), preferred_element_type=jnp.float32)
    out = jnp.asarray(gamma, jnp.float32).reshape(()) * o + x
    return out.reshape(B, C, H, W).astype(x_nchw.dtype)


# --------------------------- parameter setup ------------------------------- #
def make_params(key, n_in):
    """Deterministic stand-in for conv1d(n_in, n_in, ks=1) + spectral_norm."""
    # TODO(synk): spectral-norm power iteration is training-time state; it is
    # emulated here outside the kernel (the kernel consumes the normalized W).
    kw, ku = jax.random.split(key)
    w = jax.random.normal(kw, (n_in, n_in), jnp.float32) * jnp.sqrt(2.0 / n_in)
    u = jax.random.normal(ku, (n_in,), jnp.float32)
    u = u / (jnp.linalg.norm(u) + 1e-12)
    v = w.T @ u
    v = v / (jnp.linalg.norm(v) + 1e-12)
    u = w @ v
    u = u / (jnp.linalg.norm(u) + 1e-12)
    sigma = u @ w @ v
    w_sn = w / sigma
    gamma = jnp.zeros((1,), jnp.float32)  # nn.Parameter(tensor([0.]))
    return w_sn, gamma


# ---------------------------------- main ------------------------------------ #
if __name__ == "__main__":
    key = jax.random.PRNGKey(0)
    kx, kp, kx2 = jax.random.split(key, 3)

    B, C, H, W = 2, 8, 16, 16
    x = jax.random.normal(kx, (B, C, H, W), jnp.float32)
    w_sn, gamma0 = make_params(kp, C)

    # Module-faithful run: gamma initialized to 0 -> output equals the input.
    out0 = jax.block_until_ready(simple_self_attention(x, w_sn, gamma0))
    assert jnp.allclose(out0, x, atol=1e-6), "gamma=0 residual path mismatch"

    # Non-trivial gamma: tight check vs a bf16-matched reference, loose sanity
    # check vs the pure-f32 math reference (documents bf16 MXU approximation).
    gamma_nz = jnp.full((1,), 0.5, jnp.float32)
    out_nz = jax.block_until_ready(simple_self_attention(x, w_sn, gamma_nz))
    ref_bf = simple_self_attention_ref(x, w_sn, gamma_nz, matmul_dtype=jnp.bfloat16)
    ref_f32 = simple_self_attention_ref(x, w_sn, gamma_nz, matmul_dtype=jnp.float32)
    scale = float(jnp.max(jnp.abs(ref_bf)))
    assert jnp.allclose(out_nz, ref_bf, rtol=1e-2, atol=1e-2 * scale), "bf16-matched mismatch"
    assert jnp.allclose(out_nz, ref_f32, rtol=5e-2, atol=5e-2 * scale), "f32 sanity mismatch"

    # sym=True branch + a non-lane-aligned spatial size (exercises N padding).
    B2, C2, H2, W2 = 2, 8, 7, 7
    x2 = jax.random.normal(kx2, (B2, C2, H2, W2), jnp.float32)
    w2, _ = make_params(kp, C2)
    gamma2 = jnp.full((1,), 0.7, jnp.float32)
    out2 = jax.block_until_ready(simple_self_attention(x2, w2, gamma2, sym=True))
    ref2 = simple_self_attention_ref(x2, w2, gamma2, sym=True, matmul_dtype=jnp.bfloat16)
    scale2 = float(jnp.max(jnp.abs(ref2)))
    assert jnp.allclose(out2, ref2, rtol=1e-2, atol=1e-2 * scale2), "padded/sym mismatch"

    print("KERNEL_OK")
</pallas_src>

<mosaic_0001>
module attributes {stable_mosaic.version = 11 : i64} {
  func.func @_ssa_kernel(%arg0: i32, %arg1: memref<1xf32, #tpu.memory_space<smem>>, %arg2: memref<8x8xf32, #tpu.memory_space<vmem>>, %arg3: memref<2x8x256xf32, #tpu.memory_space<vmem>>, %arg4: memref<2x8x256xf32, #tpu.memory_space<vmem>>) attributes {dimension_semantics = [#tpu.dimension_semantics<parallel>], iteration_bounds = array<i64: 1>, scalar_prefetch = 0 : i64, scratch_operands = 0 : i64, tpu.core_type = #tpu.core_type<tc>, window_params = [{transform_indices = @transform_0, window_bounds = array<i64: 1>}, {pipeline_mode = #tpu.pipeline_mode<synchronous>, transform_indices = @transform_1, window_bounds = array<i64: 8, 8>}, {transform_indices = @transform_2, window_bounds = array<i64: 2, 8, 256>}, {transform_indices = @transform_3, window_bounds = array<i64: 2, 8, 256>}]} {
    %c0 = arith.constant 0 : index
    %0 = memref.load %arg1[%c0] : memref<1xf32, #tpu.memory_space<smem>>
    %c0_0 = arith.constant 0 : index
    %c0_1 = arith.constant 0 : index
    %1 = vector.load %arg2[%c0_0, %c0_1] : memref<8x8xf32, #tpu.memory_space<vmem>>, vector<8x8xf32>
    %2 = arith.truncf %1 : vector<8x8xf32> to vector<8x8xbf16>
    %c0_2 = arith.constant 0 : index
    %c0_3 = arith.constant 0 : index
    %c0_4 = arith.constant 0 : index
    %3 = vector.load %arg3[%c0_2, %c0_3, %c0_4] : memref<2x8x256xf32, #tpu.memory_space<vmem>>, vector<1x8x256xf32>
    %4 = vector.shape_cast %3 : vector<1x8x256xf32> to vector<8x256xf32>
    %5 = arith.truncf %4 : vector<8x256xf32> to vector<8x256xbf16>
    %cst = arith.constant dense<0.000000e+00> : vector<8x8xf32>
    %6 = tpu.matmul %5, %5, %cst {dimension_numbers = #tpu.dot_dimension_numbers<[1], [1], [0], [0], [0, 0, 1, 0], [], []>} : vector<8x256xbf16>, vector<8x256xbf16>, vector<8x8xf32> -> vector<8x8xf32>
    %7 = arith.truncf %6 : vector<8x8xf32> to vector<8x8xbf16>
    %c0_i32 = arith.constant 0 : i32
    %c256_i32 = arith.constant 256 : i32
    %8 = arith.muli %c0_i32, %c256_i32 : i32
    %9 = tpu.assume_multiple %8, 256 : i32
    %c0_5 = arith.constant 0 : index
    %c0_6 = arith.constant 0 : index
    %10 = arith.index_cast %9 : i32 to index
    %11 = vector.load %arg3[%c0_5, %c0_6, %10] : memref<2x8x256xf32, #tpu.memory_space<vmem>>, vector<1x8x256xf32>
    %12 = vector.shape_cast %11 : vector<1x8x256xf32> to vector<8x256xf32>
    %13 = arith.truncf %12 : vector<8x256xf32> to vector<8x256xbf16>
    %cst_7 = arith.constant dense<0.000000e+00> : vector<8x256xf32>
    %14 = tpu.matmul %2, %13, %cst_7 {dimension_numbers = #tpu.dot_dimension_numbers<[1], [0], [0], [1], [0, 0, 1, 1], [], []>} : vector<8x8xbf16>, vector<8x256xbf16>, vector<8x256xf32> -> vector<8x256xf32>
    %15 = arith.truncf %14 : vector<8x256xf32> to vector<8x256xbf16>
    %cst_8 = arith.constant dense<0.000000e+00> : vector<8x256xf32>
    %16 = tpu.matmul %7, %15, %cst_8 {dimension_numbers = #tpu.dot_dimension_numbers<[1], [0], [0], [1], [0, 0, 1, 1], [], []>} : vector<8x8xbf16>, vector<8x256xbf16>, vector<8x256xf32> -> vector<8x256xf32>
    %17 = vector.broadcast %0 : f32 to vector<8x256xf32>
    %18 = arith.mulf %17, %16 : vector<8x256xf32>
    %19 = arith.addf %18, %12 : vector<8x256xf32>
    %c0_9 = arith.constant 0 : index
    %c0_10 = arith.constant 0 : index
    %20 = arith.index_cast %9 : i32 to index
    %21 = vector.load %arg4[%c0_9, %c0_10, %20] : memref<2x8x256xf32, #tpu.memory_space<vmem>>, vector<1x8x256xf32>
    %22 = vector.shape_cast %21 : vector<1x8x256xf32> to vector<8x256xf32>
    %23 = vector.shape_cast %19 : vector<8x256xf32> to vector<1x8x256xf32>
    tpu.vector_store %arg4[%c0_9, %c0_10, %20], %23 {strides = array<i32>} : memref<2x8x256xf32, #tpu.memory_space<vmem>>, vector<1x8x256xf32>,
    %c1_i32 = arith.constant 1 : i32
    %c1 = arith.constant 1 : index
    %c0_11 = arith.constant 0 : index
    %c0_12 = arith.constant 0 : index
    %24 = vector.load %arg3[%c1, %c0_11, %c0_12] : memref<2x8x256xf32, #tpu.memory_space<vmem>>, vector<1x8x256xf32>
    %25 = vector.shape_cast %24 : vector<1x8x256xf32> to vector<8x256xf32>
    %26 = arith.truncf %25 : vector<8x256xf32> to vector<8x256xbf16>
    %cst_13 = arith.constant dense<0.000000e+00> : vector<8x8xf32>
    %27 = tpu.matmul %26, %26, %cst_13 {dimension_numbers = #tpu.dot_dimension_numbers<[1], [1], [0], [0], [0, 0, 1, 0], [], []>} : vector<8x256xbf16>, vector<8x256xbf16>, vector<8x8xf32> -> vector<8x8xf32>
    %28 = arith.truncf %27 : vector<8x8xf32> to vector<8x8xbf16>
    %c0_i32_14 = arith.constant 0 : i32
    %c256_i32_15 = arith.constant 256 : i32
    %29 = arith.muli %c0_i32_14, %c256_i32_15 : i32
    %30 = tpu.assume_multiple %29, 256 : i32
    %c1_16 = arith.constant 1 : index
    %c0_17 = arith.constant 0 : index
    %31 = arith.index_cast %30 : i32 to index
    %32 = vector.load %arg3[%c1_16, %c0_17, %31] : memref<2x8x256xf32, #tpu.memory_space<vmem>>, vector<1x8x256xf32>
    %33 = vector.shape_cast %32 : vector<1x8x256xf32> to vector<8x256xf32>
    %34 = arith.truncf %33 : vector<8x256xf32> to vector<8x256xbf16>
    %cst_18 = arith.constant dense<0.000000e+00> : vector<8x256xf32>
    %35 = tpu.matmul %2, %34, %cst_18 {dimension_numbers = #tpu.dot_dimension_numbers<[1], [0], [0], [1], [0, 0, 1, 1], [], []>} : vector<8x8xbf16>, vector<8x256xbf16>, vector<8x256xf32> -> vector<8x256xf32>
    %36 = arith.truncf %35 : vector<8x256xf32> to vector<8x256xbf16>
    %cst_19 = arith.constant dense<0.000000e+00> : vector<8x256xf32>
    %37 = tpu.matmul %28, %36, %cst_19 {dimension_numbers = #tpu.dot_dimension_numbers<[1], [0], [0], [1], [0, 0, 1, 1], [], []>} : vector<8x8xbf16>, vector<8x256xbf16>, vector<8x256xf32> -> vector<8x256xf32>
    %38 = vector.broadcast %0 : f32 to vector<8x256xf32>
    %39 = arith.mulf %38, %37 : vector<8x256xf32>
    %40 = arith.addf %39, %33 : vector<8x256xf32>
    %c1_20 = arith.constant 1 : index
    %c0_21 = arith.constant 0 : index
    %41 = arith.index_cast %30 : i32 to index
    %42 = vector.load %arg4[%c1_20, %c0_21, %41] : memref<2x8x256xf32, #tpu.memory_space<vmem>>, vector<1x8x256xf32>
    %43 = vector.shape_cast %42 : vector<1x8x256xf32> to vector<8x256xf32>
    %44 = vector.shape_cast %40 : vector<8x256xf32> to vector<1x8x256xf32>
    tpu.vector_store %arg4[%c1_20, %c0_21, %41], %44 {strides = array<i32>} : memref<2x8x256xf32, #tpu.memory_space<vmem>>, vector<1x8x256xf32>,
    %c1_i32_22 = arith.constant 1 : i32
    return
  }
  func.func @transform_0(%arg0: i32) -> i32 {
    %c0_i32 = arith.constant 0 : i32
    %c0_i32_0 = arith.constant 0 : i32
    return %c0_i32 : i32
  }
  func.func @transform_1(%arg0: i32) -> (i32, i32) {
    %c0_i32 = arith.constant 0 : i32
    %c0_i32_0 = arith.constant 0 : i32
    %c0_i32_1 = arith.constant 0 : i32
    return %c0_i32, %c0_i32_0 : i32, i32
  }
  func.func @transform_2(%arg0: i32) -> (i32, i32, i32) {
    %c0_i32 = arith.constant 0 : i32
    %c0_i32_0 = arith.constant 0 : i32
    %c0_i32_1 = arith.constant 0 : i32
    return %arg0, %c0_i32, %c0_i32_0 : i32, i32, i32
  }
  func.func @transform_3(%arg0: i32) -> (i32, i32, i32) {
    %c0_i32 = arith.constant 0 : i32
    %c0_i32_0 = arith.constant 0 : i32
    %c0_i32_1 = arith.constant 0 : i32
    return %arg0, %c0_i32, %c0_i32_0 : i32, i32, i32
  }
}

</mosaic_0001>

<bundles_post_ra>
// kernel: tpu_custom_call.1
= control target key start
LH: loop header
LB: loop body
LE: loop exit
PB: predicated region body
PF: predicated region fallthrough
CT: control target
= control target key end

     0   :  { %9 = vsyncpa [#allocation4], 0  ;;  %s464_s0 = inlined_call_operand.<no memory space> [shape: f32[1], index: 0, kind: input, shape index: {}]   ;;  %s465_s1 = inlined_call_operand.hbm [shape: f32[8,8], index: 1, kind: input, shape index: {}]   ;;  %s466_s2 = inlined_call_operand.hbm [shape: f32[2,8,256], index: 2, kind: input, shape index: {}]   ;;  %s467_s3 = inlined_call_operand.hbm [shape: f32[2,8,256], index: 3, kind: output, shape index: {}]  }
   0x1   :  { %10 = vsyncpa [#allocation7], 0 }
   0x2   :  { %11 = vsyncpa [#allocation5], 0  ;;  %s19_s14 = sshll.u32 %s465_s1, 4  ;;  %s395_s15 = smov [#allocation3]   ;;  %s20_s14 = int_to_ptr.hbm [resolvable:$true] %s19_s14 }
   0x3   :  { %s21_s16 = sshll.u32 %s395_s15, 4  ;;  %s29_s19 = sshll.u32 %s466_s2, 4  ;;  %s22_s16 = int_to_ptr.vmem [resolvable:$true] %s21_s16  ;;  %s30_s19 = int_to_ptr.hbm [resolvable:$true] %s29_s19 }
   0x4   :  { %24 = dma.hbm_to_vmem [thread:$0]  %s20_s14, 128, %s22_s16, [#allocation4]  }
   0x5   :  { %s396_s20 = smov [#allocation6]   ;;  %s397_s22 = smov 256  }
   0x6   :  { %s31_s21 = sshll.u32 %s396_s20, 4  ;;  %s398_s23 = smov 16   ;;  %s32_s21 = int_to_ptr.vmem [resolvable:$true] %s31_s21 }
   0x7   :  { %37 = dma.hbm_to_vmem [thread:$0]  %s30_s19, 512, %s32_s21, [#allocation7], %s397_s22, %s397_s22, %s398_s23  }
   0x8   :  { %389 = dma.done.wait [#allocation4], 128  }
   0x9   :  { %390 = vsyncadd [#allocation4], 4294967168 }
   0xa   :  { %391 = dma.done.wait [#allocation7], 512  }
   0xb   :  { %392 = vsyncadd [#allocation7], 4294966784  ;;  %v50_v0 = vld [vmem:[#allocation6] sm:$0xff]  ;;  %v51_v1 = vld [vmem:[#allocation6 + $0x8] sm:$0xff]  ;;  %vm89_vm0 = vcmask 1043456   ;;  %vm85_vm1 = vcmask 64512   ;;  %v159_v32 = vstv %s464_s0 }
   0xc   :  { %v48_v2 = vld [vmem:[#allocation3] sm:$0xff]  ;;  %v52_v3 = vpack.c.bf16 %v50_v0, %v50_v0  ;;  %v53_v4 = vpack.c.bf16 %v51_v1, %v51_v1  ;;  %v433_v8 = vld [vmem:[#allocation6 + $0x10] sm:$0xff]  ;;  %s399_s0 = smov [#allocation8]   ;;  %s288_s27 = sshll.u32 %s467_s3, 4  ;;  %s289_s27 = int_to_ptr.hbm [resolvable:$true] %s288_s27 }
   0xd   :  { %v49_v7 = vpack.c.bf16 %v48_v2, %v48_v2  ;;  %v435_v9 = vld [vmem:[#allocation6 + $0x18] sm:$0xff]  ;;  %v203_v10 = vpack.c.bf16 %v433_v8, %v433_v8  ;;  %s286_s24 = sshll.u32 %s399_s0, 4  ;;  %s287_s24 = int_to_ptr.vmem [resolvable:$true] %s286_s24 }
   0xe   :  { %61 = vmatpush.bf16.xpose.msra.mxu0 %v52_v3  ;;  %74 = vmatpush.bf16.xpose.msra.mxu1 %v53_v4  ;;  %v91_v5 = vsel %vm89_vm0, %v52_v3, 0  ;;  %v94_v6 = vsel %vm89_vm0, %v53_v4, 0  ;;  %v204_v11 = vpack.c.bf16 %v435_v9, %v435_v9 }
   0xf   :  { %103 = vmatpush.bf16.msra.mxu2 %v91_v5  ;;  %116 = vmatpush.bf16.msra.mxu3 %v94_v6  ;;  %v206_v19 = vsel %vm89_vm0, %v203_v10, 0 }
  0x10   :  { %v209_v20 = vsel %vm89_vm0, %v204_v11, 0 }
  0x12   :  { %304 = vmatmul.msk.bf16.vlgmr.msra.gmra.mxu2 %vm85_vm1, %v49_v7  ;;  %305 = vmatmul.msk.bf16.vlgmr.msra.gmra.mxu3 %vm85_vm1, %v49_v7 }
  0x15   :  { %62 = vmatmul.bf16.vlgmr.msra.gmra.mxu0 %v52_v3  ;;  %75 = vmatmul.bf16.vlgmr.msra.gmra.mxu1 %v53_v4 }
  0x16   :  { %178 = vmatpush.bf16.xpose.msrb.mxu0 %v203_v10  ;;  %191 = vmatpush.bf16.xpose.msrb.mxu1 %v204_v11 }
  0x25   :  { %179 = vmatmul.bf16.vlgmr.msrb.gmra.mxu0 %v203_v10  ;;  %192 = vmatmul.bf16.vlgmr.msrb.gmra.mxu1 %v204_v11 }
  0x92   :  { %v63_v12 = vpop.f32.mrf.mxu0  ;;  %v76_v13 = vpop.f32.mrf.mxu1 }
  0x93   :  { %v77_v14 = vadd.f32 %v76_v13, %v63_v12 }
  0x95   :  { %v105_v15 = vpop.f32.mrf.mxu2  ;;  %v118_v16 = vpop.f32.mrf.mxu3  ;;  %v80_v21 = vpack.c.bf16 %v77_v14, %v77_v14 }
  0x96   :  { %v122_v17 = vpack.c.bf16 %v105_v15, %v105_v15  ;;  %v123_v18 = vpack.c.bf16 %v118_v16, %v118_v16 }
  0x98   :  { %v128_v22 = vsel %vm89_vm0, %v122_v17, 0  ;;  %v131_v23 = vsel %vm89_vm0, %v123_v18, 0 }
  0x99   :  { %140 = vmatpush.bf16.msrb.mxu2 %v128_v22  ;;  %153 = vmatpush.bf16.msrb.mxu3 %v131_v23 }
  0x9a   :  { %v65_v24 = vpop.f32.mrf.mxu0  ;;  %v78_v25 = vpop.f32.mrf.mxu1 }
  0x9c   :  { %306 = vmatmul.msk.bf16.vlgmr.msrb.gmra.mxu2 %vm85_vm1, %v80_v21  ;;  %307 = vmatmul.msk.bf16.vlgmr.msrb.gmra.mxu3 %vm85_vm1, %v80_v21 }
  0x9d   :  { %218 = vmatpush.bf16.msra.mxu2 %v206_v19  ;;  %231 = vmatpush.bf16.msra.mxu3 %v209_v20  ;;  %v107_v26 = vpop.f32.mrf.mxu2  ;;  %v120_v27 = vpop.f32.mrf.mxu3 }
  0xa2   :  { %v180_v28 = vpop.f32.mrf.mxu0  ;;  %v193_v29 = vpop.f32.mrf.mxu1 }
  0xa3   :  { %v194_v41 = vadd.f32 %v193_v29, %v180_v28 }
  0xa5   :  { %v197_v48 = vpack.c.bf16 %v194_v41, %v194_v41 }
  0xaa   :  { %v182_v30 = vpop.f32.mrf.mxu0  ;;  %v195_v31 = vpop.f32.mrf.mxu1 }
  0xac   :  { %308 = vmatmul.msk.bf16.vlgmr.msra.gmra.mxu2 %vm85_vm1, %v49_v7  ;;  %309 = vmatmul.msk.bf16.vlgmr.msra.gmra.mxu3 %vm85_vm1, %v49_v7 }
 0x11f   :  { %v142_v33 = vpop.f32.mrf.mxu2  ;;  %v155_v34 = vpop.f32.mrf.mxu3 }
 0x120   :  { %v160_v35 = vmul.f32 %v159_v32, %v142_v33  ;;  %v161_v36 = vmul.f32 %v159_v32, %v155_v34 }
 0x122   :  { %v162_v37 = vadd.f32 %v160_v35, %v50_v0  ;;  %v163_v38 = vadd.f32 %v161_v36, %v51_v1 }
 0x124   :  { %164 = vst [vmem:[#allocation8] sm:$0xff] %v162_v37 }
 0x125   :  { %165 = vst [vmem:[#allocation8 + $0x8] sm:$0xff] %v163_v38 }
 0x127   :  { %v144_v39 = vpop.f32.mrf.mxu2  ;;  %v157_v40 = vpop.f32.mrf.mxu3 }
 0x12f   :  { %v220_v42 = vpop.f32.mrf.mxu2  ;;  %v233_v43 = vpop.f32.mrf.mxu3 }
 0x130   :  { %v237_v44 = vpack.c.bf16 %v220_v42, %v220_v42  ;;  %v238_v45 = vpack.c.bf16 %v233_v43, %v233_v43 }
 0x132   :  { %v243_v46 = vsel %vm89_vm0, %v237_v44, 0  ;;  %v246_v47 = vsel %vm89_vm0, %v238_v45, 0 }
 0x133   :  { %255 = vmatpush.bf16.msra.mxu0 %v243_v46  ;;  %268 = vmatpush.bf16.msra.mxu1 %v246_v47 }
 0x136   :  { %310 = vmatmul.msk.bf16.vlgmr.msra.gmra.mxu0 %vm85_vm1, %v197_v48  ;;  %311 = vmatmul.msk.bf16.vlgmr.msra.gmra.mxu1 %vm85_vm1, %v197_v48 }
 0x137   :  { %v222_v49 = vpop.f32.mrf.mxu2  ;;  %v235_v50 = vpop.f32.mrf.mxu3 }
 0x1b3   :  { %v257_v51 = vpop.f32.mrf.mxu0  ;;  %v270_v52 = vpop.f32.mrf.mxu1 }
 0x1b4   :  { %v274_v53 = vmul.f32 %v257_v51, %v159_v32  ;;  %v275_v54 = vmul.f32 %v270_v52, %v159_v32 }
 0x1b6   :  { %v276_v55 = vadd.f32 %v274_v53, %v433_v8  ;;  %v277_v56 = vadd.f32 %v275_v54, %v435_v9 }
 0x1b8   :  { %280 = vst [vmem:[#allocation8 + $0x10] sm:$0xff] %v276_v55 }
 0x1b9   :  { %281 = vst [vmem:[#allocation8 + $0x18] sm:$0xff] %v277_v56 }
 0x1ba   :  { %294 = dma.vmem_to_hbm [thread:$0]  %s287_s24, 512, %s289_s27, [#allocation5], %s397_s22, %s397_s22, %s398_s23  }
 0x1bb   :  { %v259_v57 = vpop.f32.mrf.mxu0  ;;  %v272_v58 = vpop.f32.mrf.mxu1 }
 0x1bc   :  { %393 = dma.done.wait [#allocation5], 512  }
 0x1bd   :  { %394 = vsyncadd [#allocation5], 4294966784 }
 0x1be   :  { %299 = vsyncpa [#allocation4], 1 }
 0x1bf   :  { %300 = vsyncpa [#allocation7], 1 }
 0x1c0   :  { %301 = vsyncpa [#allocation5], 1 }

</bundles_post_ra>
